<compile_context>
chip_gen: v7x
topology: tpu7x:2x2x1
jax: 0.10.0
libtpu: 0.0.40
codegen_flags: <defaults>
</compile_context>

<pallas_src>
import jax
import jax.numpy as jnp
from jax.experimental import pallas as pl
from jax.experimental.pallas import tpu as pltpu


def _l2norm_kernel(x_ref, w_ref, o_ref):
    # x_ref: (1, C, T) spatial-on-lanes block; w_ref: (1, C, 1); o_ref: (1, C, T)
    x = x_ref[...].astype(jnp.float32)
    # Channel reduction over a non-minor axis -> elementwise VPU adds across vregs.
    sq = jnp.sum(x * x, axis=1, keepdims=True)              # (1, 1, T)
    # F.normalize's eps=1e-12 clamp on the norm == clamp squared-norm at 1e-24.
    inv = jax.lax.rsqrt(jnp.maximum(sq, 1e-24))             # single EUP op
    y = x * inv * w_ref[...].astype(jnp.float32)            # per-channel scale
    o_ref[...] = y.astype(o_ref.dtype)


def _choose_tile_hw(C, HW, dtype_bytes, target_bytes=2 << 20):
    """Pick the lane tile: a multiple of 128 that divides the 128-padded spatial
    size and keeps each (1, C, tile) block near `target_bytes` (~2 MiB)."""
    hw_padded = pl.cdiv(HW, 128) * 128
    max_lanes = max(128, (target_bytes // max(1, C * dtype_bytes)) // 128 * 128)
    tile = 128
    t = 128
    while t <= min(max_lanes, hw_padded):
        if hw_padded % t == 0:
            tile = t
        t += 128
    return hw_padded, tile


def l2norm(x_nchw, weight):
    """SFD L2Norm forward: F.normalize(x, dim=1) * weight[None, :, None, None].

    x_nchw: (N, C, H, W); weight: (C,). Returns (N, C, H, W)."""
    N, C, H, W = x_nchw.shape
    HW = H * W
    dtype_bytes = jnp.dtype(x_nchw.dtype).itemsize
    hw_padded, tile_hw = _choose_tile_hw(C, HW, dtype_bytes)

    x3d = x_nchw.reshape(N, C, HW)               # contiguous reshape, no transpose
    if hw_padded != HW:
        # Pad the spatial axis so the grid divides evenly (per-column math is
        # independent, so padded columns produce zeros and are sliced off).
        x3d = jnp.pad(x3d, ((0, 0), (0, 0), (0, hw_padded - HW)))
    w3d = weight.reshape(1, C, 1)

    grid = (N, hw_padded // tile_hw)
    block_bytes = C * tile_hw * dtype_bytes
    # Double-buffered in + out blocks + weight + slack; stays under v7x's 64 MiB
    # physical VMEM, raises the v5e (16 MiB) / v6e (32 MiB) scoped defaults.
    vmem_limit = int(min(48 << 20, max(32 << 20, 6 * block_bytes)))

    cost = pl.CostEstimate(
        flops=3 * N * C * HW,
        transcendentals=N * HW,
        bytes_accessed=2 * N * C * HW * dtype_bytes,
    )

    out3d = pl.pallas_call(
        _l2norm_kernel,
        out_shape=jax.ShapeDtypeStruct((N, C, hw_padded), x_nchw.dtype),
        grid_spec=pltpu.PrefetchScalarGridSpec(
            num_scalar_prefetch=0,
            grid=grid,
            in_specs=[
                pl.BlockSpec((1, C, tile_hw), lambda n, j: (n, 0, j)),
                pl.BlockSpec((1, C, 1), lambda n, j: (0, 0, 0)),
            ],
            out_specs=pl.BlockSpec((1, C, tile_hw), lambda n, j: (n, 0, j)),
        ),
        compiler_params=pltpu.CompilerParams(
            dimension_semantics=("parallel", "parallel"),
            vmem_limit_bytes=vmem_limit,
        ),
        cost_estimate=cost,
    )(x3d, w3d)

    if hw_padded != HW:
        out3d = out3d[:, :, :HW]
    return out3d.reshape(N, C, H, W)


def l2norm_reference(x_nchw, weight):
    """Pure-JAX reference mirroring F.normalize(x, dim=1) * weight[None,:,None,None]."""
    norm = jnp.sqrt(jnp.sum(x_nchw.astype(jnp.float32) ** 2, axis=1, keepdims=True))
    norm = jnp.maximum(norm, 1e-12)
    return (x_nchw / norm) * weight[None, :, None, None]


if __name__ == "__main__":
    key = jax.random.PRNGKey(0)
    scale = 20.0  # typical SSD/SFD L2Norm init; nn.init.constant(weight, scale)

    # Primary small case (divisible spatial size).
    N, C, H, W = 2, 4, 16, 16
    x = jax.random.normal(key, (N, C, H, W), dtype=jnp.float32)
    weight = jnp.full((C,), scale, dtype=jnp.float32)

    out = jax.block_until_ready(l2norm(x, weight))
    ref = l2norm_reference(x, weight)
    assert out.shape == (N, C, H, W)
    assert jnp.allclose(out, ref, atol=1e-5, rtol=1e-5), "mismatch vs reference"

    # Secondary case exercising the non-128-divisible spatial (padding) path.
    k2 = jax.random.PRNGKey(1)
    N2, C2, H2, W2 = 1, 8, 10, 10
    x2 = jax.random.normal(k2, (N2, C2, H2, W2), dtype=jnp.float32)
    w2 = jnp.full((C2,), scale, dtype=jnp.float32)
    out2 = jax.block_until_ready(l2norm(x2, w2))
    ref2 = l2norm_reference(x2, w2)
    assert out2.shape == (N2, C2, H2, W2)
    assert jnp.allclose(out2, ref2, atol=1e-5, rtol=1e-5), "mismatch vs reference (padded path)"

    print("KERNEL_OK")
</pallas_src>

<mosaic_0001>
module attributes {stable_mosaic.version = 11 : i64} {
  func.func @_l2norm_kernel(%arg0: i32, %arg1: i32, %arg2: memref<1x4x256xf32, #tpu.memory_space<vmem>>, %arg3: memref<1x4x1xf32, #tpu.memory_space<vmem>>, %arg4: memref<1x4x256xf32, #tpu.memory_space<vmem>>) attributes {dimension_semantics = [#tpu.dimension_semantics<parallel>, #tpu.dimension_semantics<parallel>], iteration_bounds = array<i64: 2, 1>, scalar_prefetch = 0 : i64, scratch_operands = 0 : i64, tpu.core_type = #tpu.core_type<tc>, window_params = [{transform_indices = @transform_0, window_bounds = array<i64: 1, 4, 256>}, {pipeline_mode = #tpu.pipeline_mode<synchronous>, transform_indices = @transform_1, window_bounds = array<i64: 1, 4, 1>}, {transform_indices = @transform_2, window_bounds = array<i64: 1, 4, 256>}]} {
    %c0 = arith.constant 0 : index
    %c0_0 = arith.constant 0 : index
    %c0_1 = arith.constant 0 : index
    %0 = vector.load %arg2[%c0, %c0_0, %c0_1] : memref<1x4x256xf32, #tpu.memory_space<vmem>>, vector<1x4x256xf32>
    %1 = arith.mulf %0, %0 : vector<1x4x256xf32>
    %cst = arith.constant dense<0.000000e+00> : vector<1x256xf32>
    %2 = vector.multi_reduction <add>, %1, %cst [1] : vector<1x4x256xf32> to vector<1x256xf32>
    %3 = vector.shape_cast %2 : vector<1x256xf32> to vector<1x1x256xf32>
    %cst_2 = arith.constant 1.000000e-24 : f32
    %4 = vector.broadcast %cst_2 : f32 to vector<1x1x256xf32>
    %5 = arith.maximumf %3, %4 : vector<1x1x256xf32>
    %6 = math.rsqrt %5 : vector<1x1x256xf32>
    %7 = vector.broadcast %6 : vector<1x1x256xf32> to vector<1x4x256xf32>
    %8 = arith.mulf %0, %7 : vector<1x4x256xf32>
    %c0_3 = arith.constant 0 : index
    %c0_4 = arith.constant 0 : index
    %c0_5 = arith.constant 0 : index
    %9 = vector.load %arg3[%c0_3, %c0_4, %c0_5] : memref<1x4x1xf32, #tpu.memory_space<vmem>>, vector<1x4x1xf32>
    %10 = vector.broadcast %9 : vector<1x4x1xf32> to vector<1x4x256xf32>
    %11 = arith.mulf %8, %10 : vector<1x4x256xf32>
    %c0_6 = arith.constant 0 : index
    %c0_7 = arith.constant 0 : index
    %c0_8 = arith.constant 0 : index
    %12 = vector.load %arg4[%c0_6, %c0_7, %c0_8] : memref<1x4x256xf32, #tpu.memory_space<vmem>>, vector<1x4x256xf32>
    tpu.vector_store %arg4[%c0_6, %c0_7, %c0_8], %11 {strides = array<i32>} : memref<1x4x256xf32, #tpu.memory_space<vmem>>, vector<1x4x256xf32>,
    return
  }
  func.func @transform_0(%arg0: i32, %arg1: i32) -> (i32, i32, i32) {
    %c0_i32 = arith.constant 0 : i32
    %c0_i32_0 = arith.constant 0 : i32
    return %arg0, %c0_i32, %arg1 : i32, i32, i32
  }
  func.func @transform_1(%arg0: i32, %arg1: i32) -> (i32, i32, i32) {
    %c0_i32 = arith.constant 0 : i32
    %c0_i32_0 = arith.constant 0 : i32
    %c0_i32_1 = arith.constant 0 : i32
    %c0_i32_2 = arith.constant 0 : i32
    return %c0_i32, %c0_i32_0, %c0_i32_1 : i32, i32, i32
  }
  func.func @transform_2(%arg0: i32, %arg1: i32) -> (i32, i32, i32) {
    %c0_i32 = arith.constant 0 : i32
    %c0_i32_0 = arith.constant 0 : i32
    return %arg0, %c0_i32, %arg1 : i32, i32, i32
  }
}

</mosaic_0001>

<bundles_post_ra>
// kernel: tpu_custom_call.1
= control target key start
LH: loop header
LB: loop body
LE: loop exit
PB: predicated region body
PF: predicated region fallthrough
CT: control target
= control target key end

     0   :  { %7 = vsyncpa [#allocation3], 0  ;;  %s723_s0 = inlined_call_operand.hbm [shape: f32[2,4,256], index: 0, kind: input, shape index: {}]   ;;  %s724_s1 = inlined_call_operand.vmem [shape: f32[1,4,1], index: 1, kind: input, shape index: {}]   ;;  %s725_s2 = inlined_call_operand.hbm [shape: f32[2,4,256], index: 2, kind: output, shape index: {}]  }
   0x1   :  { %9 = vsyncpa [#allocation3 + $0x1], 0 }
   0x2   :  { %10 = vsyncpa [#allocation4], 0 }
   0x3   :  { %12 = vsyncpa [#allocation4 + $0x1], 0  ;;  %s544_s9 = smov 0   ;;  %s546_s10 = smov 0  }
   0x4   :  { %s548_s11 = smov 0   ;;  %s550_s12 = smov 0  }
   0x5   :  { %s552_s13 = smov 0   ;;  %s554_s14 = smov 0  }
   0x6 LB: > { %s325_s15 = sadd.s32 4294967295, %s523_s14   ;;  %s326_s16 = sadd.s32 4294967294, %s523_s14   ;;  %s523_s14 = sphi %s554_s14, %s18_s14   ;;  %s519_s13 = sphi %s552_s13, %s741_s13   ;;  %s515_s12 = sphi %s550_s12, %s740_s12   ;;  %s511_s11 = sphi %s548_s11, %s739_s11   ;;  %s507_s10 = sphi %s546_s10, %s738_s10   ;;  %s503_s9 = sphi %s544_s9, %s737_s9  }
   0x7   : > { %s30_s17 = sadd.s32 1, %s519_s13  ;;  %s39_s18 = sadd.s32 1, %s511_s11 }
   0x8   : > { %p32_p0 = scmp.ge.s32.totalorder %s30_s17, 2  ;;  %p46_p1 = scmp.ne.s32.totalorder %s511_s11, %s507_s10 }
   0x9   : > { %p47_p2 = scmp.eq.s32.totalorder %s523_s14, 0  ;;  %p52_p3 = scmp.ne.s32.totalorder %s507_s10, %s503_s9 }
   0xa   : > { %s743_s17 = smov (%p32_p0, %s30_s17), 0  ;;  %p53_p5 = scmp.eq.s32.totalorder %s325_s15, 0 }
   0xb   : > { %p585_p4 = por %p47_p2, %p46_p1  ;;  %s34_s20 = ssub.s32 %s519_s13, %s743_s17 }
   0xc   : > { %p99_p6 = scmp.eq.s32.totalorder %s325_s15, 1  ;;  %p37_p7 = scmp.eq.s32.totalorder %s34_s20, 0 }
   0xd   : > { %p591_p8 = por %p53_p5, %p52_p3  ;;  %p105_p10 = scmp.eq.s32.totalorder %s326_s16, 1 }
   0xe   : > { %p595_p9 = por %p99_p6, %p46_p1  ;;  %p354_p13 = scmp.lt.s32.totalorder %s523_s14, 2 }
   0xf   : > { %s600_s23 = scalar_select %p37_p7, %s511_s11, %s39_s18  }
  0x10   : > { %s729_s22 = scalar_select %p595_p9, 1, 0 }
  0x11   : > { %p602_p11 = por %p105_p10, %p52_p3  ;;  %s128_s25 = sand.u32 1, %s511_s11  }
  0x12   : > { %s329_s26 = sshll.u32 %s128_s25, 3  ;;  %s340_s27 = sshll.u32 %s519_s13, 7 }
  0x13   : > { %s730_s24 = scalar_select %p602_p11, 1, 0 }
  0x14   : > { %s613_s30 = scalar_lea.hbm %s723_s0, %s340_s27  ;;  %s132_s3 = scalar_lea.vmem [#allocation2], %s329_s26 }
  0x15   : > { %s142_s4 = sshll.u32 %s132_s3, 4  ;;  %p619_p0 = pnand %p354_p13, %p585_p4  ;;  %s615_s4 = int_to_ptr.vmem [resolvable:$true] %s142_s4 }
  0x16   : > { %s129_s6 = scalar_lea.sflag [#allocation3], %s128_s25  ;;  %s411_s7 = scalar_lea.hbm %s613_s30, 128 }
  0x17   : > { %p412_p3 = scmp.ne.s32.totalorder %s613_s30, %s411_s7  ;;  %p413_p5 = pneg %p619_p0 }
  0x18   : > { %s416_s16 = scalar_lea.hbm %s723_s0, 256  ;;  %p417_p4 = scmp.lt.u32.totalorder %s613_s30, %s723_s0 }
  0x19   : > { %p414_p6 = pnand %p413_p5, %p412_p3  ;;  %p418_p10 = scmp.lt.u32.totalorder %s416_s16, %s411_s7 }
  0x1a   : > { %p420_p12 = scmp.lt.u32.totalorder %s411_s7, %s613_s30 }
  0x1b   : > { %p415_p7 = pneg %p414_p6  ;;  %p419_p13 = por %p418_p10, %p417_p4 }
  0x1d   : > { %p421_p1 = por %p420_p12, %p419_p13 }
  0x1f   : > { %p422_p2 = pnand %p421_p1, %p415_p7 }
  0x21   : > { %425 = shalt.err (!%p422_p2)
}
  0x22   : > { %s426_s20 = scalar_lea.vmem %s615_s4, 128  ;;  %s525_s25 = smov [#allocation2]  }
  0x23   : > { %p427_p3 = scmp.ne.s32.totalorder %s615_s4, %s426_s20  ;;  %s431_s26 = sshll.u32 %s525_s25, 4  ;;  %s432_s26 = int_to_ptr.vmem [resolvable:$false] %s431_s26 }
  0x24   : > { %s433_s27 = scalar_lea.vmem %s432_s26, 256  ;;  %p434_p9 = scmp.lt.s32.totalorder %s615_s4, %s432_s26 }
  0x25   : > { %p429_p6 = pnand %p427_p3, %p413_p5  ;;  %p435_p4 = scmp.lt.s32.totalorder %s433_s27, %s426_s20 }
  0x27   : > { %p430_p11 = pneg %p429_p6  ;;  %p436_p10 = por %p435_p4, %p434_p9 }
  0x29   : > { %p437_p12 = pnand %p436_p10, %p430_p11 }
  0x2b   : > { %440 = shalt.err (!%p437_p12)
}
  0x2c   : > { %349 = dma.hbm_to_vmem [thread:$0]  (!%p619_p0), %s613_s30, 128, %s615_s4, %s129_s6  }
  0x2d   : > { %p732_p1 = scmp.lt.s32.totalorder %s523_s14, 3  ;;  %p733_p2 = scmp.ge.s32.totalorder %s523_s14, 1 }
  0x2f   : > { %p148_p5 = pnand %p733_p2, %p732_p1 }
  0x30   : > { %s655_s28 = sand.u32 (!%p148_p5), 1, %s507_s10  }
  0x31   : > { %151 = sbr.rel (%p148_p5) target bundleno = 205 (0xcd), region = 28  ;;  %s333_s29 = sshll.u32 (!%p148_p5), %s655_s28, 3 }
  0x32   : > { %s154_s3 = scalar_lea.sflag (!%p148_p5), [#allocation3], %s655_s28  ;;  %s157_s5 = scalar_lea.vmem (!%p148_p5), [#allocation2], %s333_s29 }
  0x38   : > { %494 = dma.done.wait (%p591_p8), %s154_s3, 128  }
  0x39   : > { %496 = vsyncadd (%p591_p8), %s154_s3, 4294967168  ;;  %v526_v0 = vmov 0   ;;  %v209_v1 = vld [vmem:[%s724_s1] sm:$0xf]  ;;  %vm185_vm0 = vcmask 1043456   ;;  %v217_v23 = vlaneseq  ;;  %s341_s21 = sshll.u32 %s515_s12, 7 }
  0x3a   : > { %406 = vset.pattern.permute.xlu0 %v526_v0  ;;  %v180_v2 = vld [vmem:[%s157_s5] sm:$0xff]  ;;  %v527_v21 = vmov 839922192   ;;  %s177_s6 = scalar_lea.vmem [#allocation5], %s333_s29  ;;  %s674_s16 = scalar_lea.hbm %s725_s2, %s341_s21 }
  0x3b   : > { %212 = vperm.xlu0 %406, %v209_v1   ;;  %v181_v3 = vmul.f32 %v180_v2, %v180_v2  ;;  %v215_v22 = vunpack.c.l.s4 %v527_v21  ;;  %v218_v27 = vshrl.u32 %v217_v23, 7  ;;  %s241_s7 = sshll.u32 %s177_s6, 4  ;;  %s225_s18 = scalar_lea.sflag [#allocation4], %s655_s28  ;;  %s676_s7 = int_to_ptr.vmem [resolvable:$true] %s241_s7 }
  0x3c   : > { %s441_s19 = scalar_lea.vmem %s676_s7, 128  ;;  %p734_p9 = scmp.ne.s32.totalorder %s729_s22, 0 }
  0x3d   : > { %v183_v4 = vcombine.high %v181_v3, %v181_v3  ;;  %v186_v5 = vsel %vm185_vm0, %v181_v3, 0.0  ;;  %v216_v26 = vunpack.c.0.s8 %v215_v22  ;;  %p442_p8 = scmp.ne.s32.totalorder %s676_s7, %s441_s19  ;;  %s528_s12 = smov [#allocation5]  }
  0x3e   : > { %v187_v7 = vrot.slane %v186_v5, 4  ;;  %s445_s20 = sshll.u32 %s528_s12, 4  ;;  %s446_s20 = int_to_ptr.vmem [resolvable:$false] %s445_s20 }
  0x3f   : > { %v193_v6 = vsel %vm185_vm0, %v183_v4, 0.0  ;;  %v219_v29 = vsub.s32 %v216_v26, %v218_v27  ;;  %p443_p11 = pnand %p442_p8, %p734_p9  ;;  %s447_s25 = scalar_lea.vmem %s446_s20, 256 }
  0x40   : > { %v194_v8 = vrot.slane %v193_v6, 4  ;;  %v188_v9 = vadd.f32 %v187_v7, %v186_v5  ;;  %p448_p7 = scmp.lt.s32.totalorder %s676_s7, %s446_s20  ;;  %p449_p13 = scmp.lt.s32.totalorder %s447_s25, %s441_s19 }
  0x41   : > { %p444_p0 = pneg %p443_p11 }
  0x42   : > { %v195_v10 = vadd.f32 %v194_v8, %v193_v6  ;;  %v189_v11 = vrot.slane %v188_v9, 2  ;;  %p450_p3 = por %p449_p13, %p448_p7 }
  0x44   : > { %v196_v12 = vrot.slane %v195_v10, 2  ;;  %v190_v13 = vadd.f32 %v189_v11, %v188_v9  ;;  %p451_p6 = pnand %p450_p3, %p444_p0 }
  0x46   : > { %v197_v14 = vadd.f32 %v196_v12, %v195_v10  ;;  %v191_v15 = vrot.slane %v190_v13, 1 }
  0x48   : > { %v198_v16 = vrot.slane %v197_v14, 1  ;;  %v192_v17 = vadd.f32 %v191_v15, %v190_v13 }
  0x4a   : > { %v199_v18 = vadd.f32 %v198_v16, %v197_v14  ;;  %v200_v19 = vmax.f32 %v192_v17, 1e-24 }
  0x4c   : > { %v201_v20 = vmax.f32 %v199_v18, 1e-24  ;;  %407 = vrsqrt.f32 %v200_v19 }
  0x4e   : > { %409 = vrsqrt.f32 %v201_v20 }
  0x56   : > { %v408_v24 = vpop.eup %407 }
  0x58   : > { %v410_v25 = vpop.eup %409 }
  0x59   : > { %v206_v28 = vcombine.low %v408_v24, %v410_v25 }
  0x5b   : > { %v208_v30 = vmul.f32 %v206_v28, %v180_v2 }
  0xba   : > { %v213_v31 = vpop.permute.xlu0 %212 }
  0xbb   : > { %v220_v32 = vrot.slane %v213_v31, %v219_v29 }
  0xbd   : > { %v222_v33 = vmul.f32 %v220_v32, %v208_v30 }
  0xbf   : > { %223 = vst [vmem:[%s177_s6] sm:$0xff] %v222_v33 }
  0xc0   : > { %454 = shalt.err (!%p451_p6)
}
  0xc1   : > { %s455_s26 = scalar_lea.hbm %s674_s16, 128  ;;  %s459_s29 = scalar_lea.hbm %s725_s2, 256 }
  0xc2   : > { %p456_p4 = scmp.ne.s32.totalorder %s674_s16, %s455_s26  ;;  %p460_p1 = scmp.lt.u32.totalorder %s674_s16, %s725_s2 }
  0xc3   : > { %p461_p2 = scmp.lt.u32.totalorder %s459_s29, %s455_s26  ;;  %p463_p8 = scmp.lt.u32.totalorder %s455_s26, %s674_s16 }
  0xc4   : > { %p457_p10 = pnand %p456_p4, %p734_p9 }
  0xc5   : > { %p462_p5 = por %p461_p2, %p460_p1 }
  0xc6   : > { %p458_p12 = pneg %p457_p10 }
  0xc7   : > { %p464_p11 = por %p463_p8, %p462_p5 }
  0xc9   : > { %p465_p0 = pnand %p464_p11, %p458_p12 }
  0xcb   : > { %468 = shalt.err (!%p465_p0)
}
  0xcc   : > { %344 = dma.vmem_to_hbm [thread:$0]  (%p734_p9), %s676_s7, 128, %s674_s16, %s225_s18  }
  0xcd PF: > { %s253_s30 = sand.u32 1, %s503_s9   ;;  %p735_p7 = scmp.ne.s32.totalorder %s730_s24, 0 }
  0xce   : > { %p736_p13 = scmp.ge.s32.totalorder %s523_s14, 2  ;;  %s254_s4 = scalar_lea.sflag [#allocation4], %s253_s30 }
  0xd0   : > { %p351_p3 = pnand %p736_p13, %p735_p7 }
  0xd2   : > { %498 = dma.done.wait (!%p351_p3), %s254_s4, 128  }
  0xd3   : > { %500 = vsyncadd (!%p351_p3), %s254_s4, 4294967168  ;;  %s18_s14 = sadd.s32 1, %s523_s14   ;;  %s737_s9 = smov %s507_s10 }
  0xd4   : > { %p15_p6 = scmp.ge.s32.totalorder %s18_s14, 4   ;;  %s738_s10 = smov %s511_s11 }
  0xd5   : > { %s739_s11 = smov %s600_s23  ;;  %s740_s12 = smov %s519_s13 }
  0xd6   : > { %s741_s13 = smov %s743_s17  ;;  %17 = sbr.rel (!%p15_p6) target bundleno = 6 (0x6), region = 73 }
  0xdd   :  { %259 = vsyncpa [#allocation3], 1 }
  0xde   :  { %261 = vsyncpa [#allocation3 + $0x1], 1 }
  0xdf   :  { %262 = vsyncpa [#allocation4], 1 }
  0xe0   :  { %264 = vsyncpa [#allocation4 + $0x1], 1 }

</bundles_post_ra>
